<compile_context>
chip_gen: v6e
topology: v6e:2x2x1
jax: 0.10.0
libtpu: 0.0.40
codegen_flags: <defaults>
</compile_context>

<pallas_src>
import functools

import jax
import jax.numpy as jnp
from jax.experimental import pallas as pl
from jax.experimental.pallas import tpu as pltpu

_DEFAULT_TILE_B = 2048    # rows per grid step; big tiles amortize ~600-cycle/step overhead
_MIN_PALLAS_BATCH = 1024  # below this, a single-step grid is launch-latency bound -> plain XLA


def _round_up(n, m):
    return ((n + m - 1) // m) * m


def _choose_tile_b(batch, tile_b):
    """Pick the batch tile.

    * B < 256: one block covering everything (rounded up to a sublane multiple).
    * B >= 256: at least two grid steps (so v7x's two TensorCores both get
      work), blocks a multiple of 128 (required by the non-covering output
      BlockSpec), as large as possible up to `tile_b`.
    """
    if batch < 256:
        return _round_up(max(batch, 1), 8)
    tile_b = max(128, (tile_b // 128) * 128)
    half = _round_up((batch + 1) // 2, 128)
    return max(128, min(tile_b, half))


def _mean_mlp_kernel(x_ref, w1_ref, b1_ref, w2_ref, b2_ref, w3_ref, b3_ref,
                     mean_ref):
    # fc_mean: Linear(num_inputs->128) -> ReLU -> Linear(128->64) -> ReLU
    #          -> Linear(64->1) -> Tanh, then torch.tanh again in forward().
    # Layers 1 & 2 on the MXU: bf16 operands (single pass), f32 accumulate.
    x = x_ref[...].astype(jnp.bfloat16)
    h1 = jnp.dot(x, w1_ref[...], preferred_element_type=jnp.float32)
    h1 = jnp.maximum(h1 + b1_ref[...], 0.0)

    h2 = jnp.dot(h1.astype(jnp.bfloat16), w2_ref[...],
                 preferred_element_type=jnp.float32)
    h2 = jnp.maximum(h2 + b2_ref[...], 0.0)

    # Layer 3 (64 -> 1) on VPU (mul) + XLU (lane reduce): avoids MXU weight-load
    # passes that would scale with the batch tile.  Keep (tb, 1); the tiny
    # column store hides under the MXU work of layers 1-2.
    out = jnp.sum(h2 * w3_ref[...], axis=-1, keepdims=True)   # (tb, 1) f32
    out = jnp.tanh(out + b3_ref[...])                         # Tanh in nn.Sequential
    mean_ref[...] = jnp.tanh(out).astype(mean_ref.dtype)      # torch.tanh in forward()


def _mean_std_reference(x, params):
    """Pure-JAX reference / small-batch fallback (identical math, f32)."""
    w1, b1, w2, b2, w3, b3, logstd_b = params
    h1 = jnp.maximum(x @ w1 + b1, 0.0)
    h2 = jnp.maximum(h1 @ w2 + b2, 0.0)
    mean = jnp.tanh(jnp.tanh(h2 @ w3 + b3))
    std = jnp.broadcast_to(jnp.exp(jnp.tanh(logstd_b)).reshape(1, 1), mean.shape)
    return mean, std


@functools.partial(jax.jit, static_argnames=("tile_b", "use_pallas"))
def diag_gaussian_tan(x, params, tile_b=_DEFAULT_TILE_B, use_pallas=None):
    """DiagGaussianTan forward. Returns (mean, std), each shaped (B, 1)."""
    w1, b1, w2, b2, w3, b3, logstd_b = params
    B, num_inputs = x.shape

    if use_pallas is None:
        use_pallas = B >= _MIN_PALLAS_BATCH
    if not use_pallas:
        # Small-batch fallback: a single-step Pallas grid is dominated by fixed
        # launch + DMA warm-up; XLA's fused matmul+elementwise path wins here.
        return _mean_std_reference(x, params)

    tb = _choose_tile_b(B, tile_b)
    grid = pl.cdiv(B, tb)
    b_pad = grid * tb            # only the tiny (B,1) OUTPUT is padded; x is not.

    w3_row = w3.reshape(1, -1)          # (64, 1) -> (1, 64) row for the VPU dot
    w1_bf = w1.astype(jnp.bfloat16)     # single-pass MXU operands (f32 accumulate)
    w2_bf = w2.astype(jnp.bfloat16)

    mean_pad = pl.pallas_call(
        _mean_mlp_kernel,
        out_shape=jax.ShapeDtypeStruct((b_pad, 1), jnp.float32),
        grid=(grid,),
        in_specs=[
            # x pipelined over the batch; last block may overhang (rows are
            # independent, garbage rows are sliced off below).
            pl.BlockSpec((tb, num_inputs), lambda i: (i, 0)),
            pl.BlockSpec(w1_bf.shape, lambda i: (0, 0)),   # weights/biases resident
            pl.BlockSpec(b1.shape, lambda i: (0, 0)),
            pl.BlockSpec(w2_bf.shape, lambda i: (0, 0)),
            pl.BlockSpec(b2.shape, lambda i: (0, 0)),
            pl.BlockSpec(w3_row.shape, lambda i: (0, 0)),
            pl.BlockSpec(b3.shape, lambda i: (0, 0)),
        ],
        out_specs=pl.BlockSpec((tb, 1), lambda i: (i, 0)),
        compiler_params=pltpu.CompilerParams(
            dimension_semantics=("parallel",)),            # v7x: 2 TCs split the batch
    )(x, w1_bf, b1, w2_bf, b2, w3_row, b3)

    mean = mean_pad[:B]

    # std = exp(tanh(0 + logstd_bias)) is independent of x: one scalar, broadcast.
    std = jnp.broadcast_to(jnp.exp(jnp.tanh(logstd_b)).reshape(1, 1), (B, 1))
    return mean, std


def _init_normc(key, out_features, in_features):
    """PyTorch init_normc_: normal(0,1) rows normalized over the input dim; bias=0.
    Returns weight as (in, out) for x @ W, and bias as (1, out)."""
    w = jax.random.normal(key, (out_features, in_features), dtype=jnp.float32)
    w = w * jax.lax.rsqrt(jnp.sum(w * w, axis=1, keepdims=True))
    return w.T, jnp.zeros((1, out_features), dtype=jnp.float32)


def make_params(key, num_inputs):
    k1, k2, k3 = jax.random.split(key, 3)
    w1, b1 = _init_normc(k1, 128, num_inputs)
    w2, b2 = _init_normc(k2, 64, 128)
    w3, b3 = _init_normc(k3, 1, 64)
    logstd_b = jnp.zeros((1, 1), dtype=jnp.float32)   # AddBias(torch.zeros(1))
    return (w1, b1, w2, b2, w3, b3, logstd_b)


if __name__ == "__main__":
    key = jax.random.PRNGKey(0)
    kp, kx1, kx2 = jax.random.split(key, 3)

    num_inputs = 32
    params = make_params(kp, num_inputs)

    # Small demo shape; force the Pallas path so the kernel itself is exercised.
    B1 = 8
    x1 = jax.random.normal(kx1, (B1, num_inputs), dtype=jnp.float32)
    mean1, std1 = diag_gaussian_tan(x1, params, use_pallas=True)
    jax.block_until_ready((mean1, std1))
    ref_mean1, ref_std1 = _mean_std_reference(x1, params)
    assert mean1.shape == (B1, 1) and std1.shape == (B1, 1)
    # bf16 MXU operands -> loosened tolerance vs. the f32 reference.
    assert jnp.allclose(mean1, ref_mean1, atol=3e-2, rtol=3e-2), "mean mismatch (B=8)"
    assert jnp.allclose(std1, ref_std1, atol=1e-6, rtol=1e-6), "std mismatch (B=8)"

    # Larger batch: exercises the 2-step parallel grid (512-row, 128-multiple
    # blocks) and the overhanging last x block (1000 = 512 + 488).
    B2 = 1000
    x2 = jax.random.normal(kx2, (B2, num_inputs), dtype=jnp.float32)
    mean2, std2 = diag_gaussian_tan(x2, params, use_pallas=True)
    jax.block_until_ready((mean2, std2))
    ref_mean2, ref_std2 = _mean_std_reference(x2, params)
    assert mean2.shape == (B2, 1) and std2.shape == (B2, 1)
    assert jnp.allclose(mean2, ref_mean2, atol=3e-2, rtol=3e-2), "mean mismatch (B=1000)"
    assert jnp.allclose(std2, ref_std2, atol=1e-6, rtol=1e-6), "std mismatch (B=1000)"

    # Auto mode at small B takes the pure-XLA fallback path; sanity-check it too.
    mean3, std3 = diag_gaussian_tan(x1, params)
    jax.block_until_ready((mean3, std3))
    assert jnp.allclose(mean3, ref_mean1, atol=1e-5, rtol=1e-5)
    assert jnp.allclose(std3, ref_std1, atol=1e-6, rtol=1e-6)

    print("KERNEL_OK")
</pallas_src>

<mosaic_0001>
module attributes {stable_mosaic.version = 11 : i64} {
  func.func @_mean_mlp_kernel(%arg0: i32, %arg1: memref<8x32xf32, #tpu.memory_space<vmem>>, %arg2: memref<32x128xbf16, #tpu.memory_space<vmem>>, %arg3: memref<1x128xf32, #tpu.memory_space<vmem>>, %arg4: memref<128x64xbf16, #tpu.memory_space<vmem>>, %arg5: memref<1x64xf32, #tpu.memory_space<vmem>>, %arg6: memref<1x64xf32, #tpu.memory_space<vmem>>, %arg7: memref<1x1xf32, #tpu.memory_space<vmem>>, %arg8: memref<8x1xf32, #tpu.memory_space<vmem>>) attributes {dimension_semantics = [#tpu.dimension_semantics<parallel>], iteration_bounds = array<i64: 1>, scalar_prefetch = 0 : i64, scratch_operands = 0 : i64, tpu.core_type = #tpu.core_type<tc>, window_params = [{transform_indices = @transform_0, window_bounds = array<i64: 8, 32>}, {pipeline_mode = #tpu.pipeline_mode<synchronous>, transform_indices = @transform_1, window_bounds = array<i64: 32, 128>}, {pipeline_mode = #tpu.pipeline_mode<synchronous>, transform_indices = @transform_2, window_bounds = array<i64: 1, 128>}, {pipeline_mode = #tpu.pipeline_mode<synchronous>, transform_indices = @transform_3, window_bounds = array<i64: 128, 64>}, {pipeline_mode = #tpu.pipeline_mode<synchronous>, transform_indices = @transform_4, window_bounds = array<i64: 1, 64>}, {pipeline_mode = #tpu.pipeline_mode<synchronous>, transform_indices = @transform_5, window_bounds = array<i64: 1, 64>}, {pipeline_mode = #tpu.pipeline_mode<synchronous>, transform_indices = @transform_6, window_bounds = array<i64: 1, 1>}, {transform_indices = @transform_7, window_bounds = array<i64: 8, 1>}]} {
    %c0 = arith.constant 0 : index
    %c0_0 = arith.constant 0 : index
    %0 = vector.load %arg1[%c0, %c0_0] : memref<8x32xf32, #tpu.memory_space<vmem>>, vector<8x32xf32>
    %1 = arith.truncf %0 : vector<8x32xf32> to vector<8x32xbf16>
    %c0_1 = arith.constant 0 : index
    %c0_2 = arith.constant 0 : index
    %2 = vector.load %arg2[%c0_1, %c0_2] : memref<32x128xbf16, #tpu.memory_space<vmem>>, vector<32x128xbf16>
    %cst = arith.constant dense<0.000000e+00> : vector<8x128xf32>
    %3 = tpu.matmul %1, %2, %cst {dimension_numbers = #tpu.dot_dimension_numbers<[1], [0], [0], [1], [0, 0, 1, 1], [], []>} : vector<8x32xbf16>, vector<32x128xbf16>, vector<8x128xf32> -> vector<8x128xf32>
    %c0_3 = arith.constant 0 : index
    %c0_4 = arith.constant 0 : index
    %4 = vector.load %arg3[%c0_3, %c0_4] : memref<1x128xf32, #tpu.memory_space<vmem>>, vector<1x128xf32>
    %5 = vector.broadcast %4 : vector<1x128xf32> to vector<8x128xf32>
    %6 = arith.addf %3, %5 : vector<8x128xf32>
    %cst_5 = arith.constant 0.000000e+00 : f32
    %7 = vector.broadcast %cst_5 : f32 to vector<8x128xf32>
    %8 = arith.maximumf %6, %7 : vector<8x128xf32>
    %9 = arith.truncf %8 : vector<8x128xf32> to vector<8x128xbf16>
    %c0_6 = arith.constant 0 : index
    %c0_7 = arith.constant 0 : index
    %10 = vector.load %arg4[%c0_6, %c0_7] : memref<128x64xbf16, #tpu.memory_space<vmem>>, vector<128x64xbf16>
    %cst_8 = arith.constant dense<0.000000e+00> : vector<8x64xf32>
    %11 = tpu.matmul %9, %10, %cst_8 {dimension_numbers = #tpu.dot_dimension_numbers<[1], [0], [0], [1], [0, 0, 1, 1], [], []>} : vector<8x128xbf16>, vector<128x64xbf16>, vector<8x64xf32> -> vector<8x64xf32>
    %c0_9 = arith.constant 0 : index
    %c0_10 = arith.constant 0 : index
    %12 = vector.load %arg5[%c0_9, %c0_10] : memref<1x64xf32, #tpu.memory_space<vmem>>, vector<1x64xf32>
    %13 = vector.broadcast %12 : vector<1x64xf32> to vector<8x64xf32>
    %14 = arith.addf %11, %13 : vector<8x64xf32>
    %cst_11 = arith.constant 0.000000e+00 : f32
    %15 = vector.broadcast %cst_11 : f32 to vector<8x64xf32>
    %16 = arith.maximumf %14, %15 : vector<8x64xf32>
    %c0_12 = arith.constant 0 : index
    %c0_13 = arith.constant 0 : index
    %17 = vector.load %arg6[%c0_12, %c0_13] : memref<1x64xf32, #tpu.memory_space<vmem>>, vector<1x64xf32>
    %18 = vector.broadcast %17 : vector<1x64xf32> to vector<8x64xf32>
    %19 = arith.mulf %16, %18 : vector<8x64xf32>
    %cst_14 = arith.constant dense<0.000000e+00> : vector<8xf32>
    %20 = vector.multi_reduction <add>, %19, %cst_14 [1] : vector<8x64xf32> to vector<8xf32>
    %21 = vector.shape_cast %20 : vector<8xf32> to vector<8x1xf32>
    %c0_15 = arith.constant 0 : index
    %c0_16 = arith.constant 0 : index
    %22 = vector.load %arg7[%c0_15, %c0_16] : memref<1x1xf32, #tpu.memory_space<vmem>>, vector<1x1xf32>
    %23 = vector.broadcast %22 : vector<1x1xf32> to vector<8x1xf32>
    %24 = arith.addf %21, %23 : vector<8x1xf32>
    %25 = math.tanh %24 : vector<8x1xf32>
    %26 = math.tanh %25 : vector<8x1xf32>
    %c0_17 = arith.constant 0 : index
    %c0_18 = arith.constant 0 : index
    %27 = vector.load %arg8[%c0_17, %c0_18] : memref<8x1xf32, #tpu.memory_space<vmem>>, vector<8x1xf32>
    tpu.vector_store %arg8[%c0_17, %c0_18], %26 {strides = array<i32>} : memref<8x1xf32, #tpu.memory_space<vmem>>, vector<8x1xf32>,
    return
  }
  func.func @transform_0(%arg0: i32) -> (i32, i32) {
    %c0_i32 = arith.constant 0 : i32
    %c0_i32_0 = arith.constant 0 : i32
    return %arg0, %c0_i32 : i32, i32
  }
  func.func @transform_1(%arg0: i32) -> (i32, i32) {
    %c0_i32 = arith.constant 0 : i32
    %c0_i32_0 = arith.constant 0 : i32
    %c0_i32_1 = arith.constant 0 : i32
    return %c0_i32, %c0_i32_0 : i32, i32
  }
  func.func @transform_2(%arg0: i32) -> (i32, i32) {
    %c0_i32 = arith.constant 0 : i32
    %c0_i32_0 = arith.constant 0 : i32
    %c0_i32_1 = arith.constant 0 : i32
    return %c0_i32, %c0_i32_0 : i32, i32
  }
  func.func @transform_3(%arg0: i32) -> (i32, i32) {
    %c0_i32 = arith.constant 0 : i32
    %c0_i32_0 = arith.constant 0 : i32
    %c0_i32_1 = arith.constant 0 : i32
    return %c0_i32, %c0_i32_0 : i32, i32
  }
  func.func @transform_4(%arg0: i32) -> (i32, i32) {
    %c0_i32 = arith.constant 0 : i32
    %c0_i32_0 = arith.constant 0 : i32
    %c0_i32_1 = arith.constant 0 : i32
    return %c0_i32, %c0_i32_0 : i32, i32
  }
  func.func @transform_5(%arg0: i32) -> (i32, i32) {
    %c0_i32 = arith.constant 0 : i32
    %c0_i32_0 = arith.constant 0 : i32
    %c0_i32_1 = arith.constant 0 : i32
    return %c0_i32, %c0_i32_0 : i32, i32
  }
  func.func @transform_6(%arg0: i32) -> (i32, i32) {
    %c0_i32 = arith.constant 0 : i32
    %c0_i32_0 = arith.constant 0 : i32
    %c0_i32_1 = arith.constant 0 : i32
    return %c0_i32, %c0_i32_0 : i32, i32
  }
  func.func @transform_7(%arg0: i32) -> (i32, i32) {
    %c0_i32 = arith.constant 0 : i32
    %c0_i32_0 = arith.constant 0 : i32
    return %arg0, %c0_i32 : i32, i32
  }
}

</mosaic_0001>

<bundles_post_ra>
// kernel: diag_gaussian_tan.1
= control target key start
LH: loop header
LB: loop body
LE: loop exit
PB: predicated region body
PF: predicated region fallthrough
CT: control target
= control target key end

     0   :  { %v311_v0 = vmov 0.0   ;;  %vm312_vm0 = vmmov 0   ;;  %vm54_vm1 = vcmask 261120   ;;  %vm220_vm2 = vcmask 523264   ;;  %s401_s1 = inlined_call_operand.vmem [shape: bf16[32,128], index: 1, kind: input, shape index: {}]   ;;  %s402_s0 = inlined_call_operand.vmem [shape: f32[8,32], index: 0, kind: input, shape index: {}]   ;;  %s403_s3 = inlined_call_operand.vmem [shape: bf16[128,64], index: 3, kind: input, shape index: {}]   ;;  %s404_s2 = inlined_call_operand.vmem [shape: f32[1,128], index: 2, kind: input, shape index: {}]   ;;  %s405_s6 = inlined_call_operand.<no memory space> [shape: f32[1,1], index: 6, kind: input, shape index: {}]   ;;  %s406_s4 = inlined_call_operand.vmem [shape: f32[1,64], index: 4, kind: input, shape index: {}]   ;;  %s407_s5 = inlined_call_operand.vmem [shape: f32[1,64], index: 5, kind: input, shape index: {}]   ;;  %s408_s7 = inlined_call_operand.vmem [shape: f32[8,1], index: 7, kind: output, shape index: {}]  }
   0x1   :  { %267 = vmatprep.subr.bf16.mxu0 %v311_v0  ;;  %v297_v1 = vld [vmem:[%s401_s1 + $0x8] sm:$0xff]   ;;  %271 = vmatprep.mubr.msk.bf16.mxu0 %vm312_vm0, %v311_v0  ;;  %v298_v2 = vld [vmem:[%s401_s1] sm:$0xff]   ;;  %v299_v4 = vld [vmem:[%s403_s3 + $0x38] sm:$0xff]   ;;  %v12_v21 = vstv %s405_s6  ;;  %vm234_vm3 = vcmask 7168  }
   0x2   :  { %275 = vmatprep.subr.bf16.mxu1 %v311_v0  ;;  %291 = vmatprep.mubr.msk.bf16.mxu1 %vm312_vm0, %v311_v0  ;;  %v29_v3 = vld [vmem:[%s402_s0] sm:$0xff]  ;;  %v300_v6 = vld [vmem:[%s403_s3 + $0x30] sm:$0xff]   ;;  %v301_v7 = vld [vmem:[%s403_s3 + $0x28] sm:$0xff]   ;;  %13 = vst [vmem:[#allocation2] sm:$0x1] %v12_v21 }
   0x3   :  { %268 = vmatpush3.bf16.msra.mxu0 %v297_v1  ;;  %v30_v5 = vpack.c.bf16 %v29_v3, %v29_v3  ;;  %276 = vmatpush3.bf16.msra.mxu1 %v299_v4  ;;  %v302_v8 = vld [vmem:[%s403_s3 + $0x20] sm:$0xff]   ;;  %v303_v9 = vld [vmem:[%s403_s3 + $0x18] sm:$0xff]   ;;  %v304_v10 = vld [vmem:[%s403_s3 + $0x10] sm:$0xff]  }
   0x4   :  { %269 = vmatprep.subr.bf16.mxu0 %v311_v0  ;;  %277 = vmatprep.subr.bf16.mxu1 %v311_v0  ;;  %v305_v11 = vld [vmem:[%s403_s3 + $0x8] sm:$0xff]   ;;  %v306_v12 = vld [vmem:[%s403_s3] sm:$0xff]  }
   0x5   :  { %v240_v13 = vld [vmem:[%s404_s2] ss:$0 sm:$0xff] }
   0x6   :  { %v244_v22 = vld [vmem:[%s406_s4] ss:$0 sm:$0xff] }
   0x7   :  { %270 = vmatpush3.bf16.msra.mxu0 %v298_v2  ;;  %278 = vmatpush3.bf16.msra.mxu1 %v300_v6  ;;  %v253_v26 = vld [vmem:[%s407_s5] ss:$0 sm:$0xff] }
   0x8   :  { %279 = vmatprep.subr.bf16.mxu1 %v311_v0 }
   0x9   :  { %v254_v32 = vld [vmem:[#allocation2] ss:$0 sm:$0xff] }
   0xa   :  { %272 = vmatmul.mubr.msk.bf16.vlgmr.msra.gmra.mxu0 %vm54_vm1, %v30_v5 }
   0xb   :  { %280 = vmatpush3.bf16.msra.mxu1 %v301_v7 }
   0xc   :  { %281 = vmatprep.subr.bf16.mxu1 %v311_v0 }
   0xf   :  { %282 = vmatpush3.bf16.msra.mxu1 %v302_v8 }
  0x10   :  { %283 = vmatprep.subr.bf16.mxu1 %v311_v0 }
  0x13   :  { %284 = vmatpush3.bf16.msra.mxu1 %v303_v9 }
  0x14   :  { %285 = vmatprep.subr.bf16.mxu1 %v311_v0 }
  0x17   :  { %286 = vmatpush3.bf16.msra.mxu1 %v304_v10 }
  0x18   :  { %287 = vmatprep.subr.bf16.mxu1 %v311_v0 }
  0x1b   :  { %288 = vmatpush3.bf16.msra.mxu1 %v305_v11 }
  0x1c   :  { %289 = vmatprep.subr.bf16.mxu1 %v311_v0 }
  0x1f   :  { %290 = vmatpush3.bf16.msra.mxu1 %v306_v12 }
  0xca   :  { %v92_v14 = vpop.f32.mrf.mxu0 }
  0xcb   :  { %v93_v15 = vadd.f32 %v240_v13, %v92_v14 }
  0xcc   :  { %v273_v16 = vpop.f32.mrf.mxu0 }
  0xcd   :  { %v98_v17 = vmax.f32 %v93_v15, 0.0 }
  0xce   :  { %v95_v18 = vpop.f32.mrf.mxu0 }
  0xcf   :  { %v99_v19 = vpack.c.bf16 %v98_v17, %v98_v17 }
  0xd0   :  { %v274_v20 = vpop.f32.mrf.mxu0 }
  0xd1   :  { %292 = vmatmul.mubr.bf16.vlgmr.msra.gmra.mxu1 %v99_v19 }
 0x191   :  { %v205_v23 = vpop.f32.mrf.mxu1 }
 0x192   :  { %v206_v24 = vadd.f32 %v244_v22, %v205_v23 }
 0x193   :  { %v293_v25 = vpop.f32.mrf.mxu1 }
 0x194   :  { %v211_v27 = vmax.f32 %v206_v24, 0.0 }
 0x195   :  { %v208_v28 = vpop.f32.mrf.mxu1 }
 0x196   :  { %v219_v29 = vmul.f32 %v253_v26, %v211_v27 }
 0x197   :  { %v294_v30 = vpop.f32.mrf.mxu1 }
 0x198   :  { %v221_v31 = vsel %vm220_vm2, %v219_v29, 0.0 }
 0x199   :  { %222 = vadd.xlane.f32.xlu0 %v221_v31 }
 0x222   :  { %v223_v33 = vpop.xlane.xlu0 %222 }
 0x223   :  { %v231_v34 = vadd.f32 %v254_v32, %v223_v33 }
 0x225   :  { %307 = vtanh.f32 %v231_v34 }
 0x232   :  { %v308_v35 = vpop.eup %307 }
 0x233   :  { %309 = vtanh.f32 %v308_v35 }
 0x240   :  { %v310_v36 = vpop.eup %309 }
 0x241   :  { %235 = vst.msk [vmem:[%s408_s7] sm:$0xff] %vm234_vm3, %v310_v36 }

</bundles_post_ra>
